<compile_context>
chip_gen: v7x
topology: tpu7x:2x2x1
jax: 0.10.0
libtpu: 0.0.40
codegen_flags: <defaults>
</compile_context>

<pallas_src>
import jax
import jax.numpy as jnp
from jax import lax
from jax.experimental import pallas as pl
from jax.experimental.pallas import tpu as pltpu
import numpy as np


# ---------------------------------------------------------------------------
# Host-side parameter setup (equivalent of IStackgram.__init__ / _create_grids)
# ---------------------------------------------------------------------------
def make_sample_coords(theta_deg, n):
    """Bilinear sample coordinates of the kept middle column.

    Matches torch affine_grid + grid_sample with align_corners=False,
    R = [[sin, cos, 0], [cos, -sin, 0]].  Returns (iy, ix), each (T, n) float32:
    image-row / image-col coordinate sampled for output row i at column n//2.
    """
    t = jnp.deg2rad(theta_deg.astype(jnp.float32))
    i = jnp.arange(n, dtype=jnp.float32)
    y_base = (2.0 * i + 1.0) / n - 1.0            # normalized output rows
    jc = n // 2
    xc = (2.0 * jc + 1.0) / n - 1.0               # normalized middle column
    sin_t = jnp.sin(t)[:, None]
    cos_t = jnp.cos(t)[:, None]
    gx = sin_t * xc + cos_t * y_base[None, :]     # (T, n) sample x (width)
    gy = cos_t * xc - sin_t * y_base[None, :]     # (T, n) sample y (height)
    ix = ((gx + 1.0) * n - 1.0) / 2.0             # unnormalize (align_corners=False)
    iy = ((gy + 1.0) * n - 1.0) / 2.0
    return iy, ix


# ---------------------------------------------------------------------------
# Pallas kernel
# ---------------------------------------------------------------------------
def istackgram_kernel(x_ref, coords_ref, o_ref):
    # x_ref:      (Bb, Tt, N, N)        bf16  image block
    # coords_ref: (Tt, 2, N)            f32   [., 0, :]=iy  [., 1, :]=ix
    # o_ref:      (1, 1, Tt, Bb, N)     f32   one sinogram row per (theta, batch)
    Bb, Tt, N, _ = x_ref.shape
    # Integer positions along the contracted image axis (sublane dim of the
    # rebuilt weight tiles).  Hoisted out of the theta loop (broadcast_in_dim
    # is not CSE'd by JAX).
    grid_pos = lax.broadcasted_iota(jnp.int32, (N, N), 0).astype(jnp.float32)

    @pl.loop(0, Tt, unroll=Tt <= 8)
    def _(t):
        c_t = coords_ref[pl.ds(t, 1)]                 # (1, 2, N) f32
        cy = c_t[:, 0, :]                             # (1, N) image-row coordinate per out row
        cx = c_t[:, 1, :]                             # (1, N) image-col coordinate per out row
        # Dense separable bilinear weights rebuilt on the VPU from the compact
        # coordinates (2-tap hat function; out-of-range taps get weight 0, which
        # reproduces grid_sample's zeros padding):
        #   wxt[c, i] = max(0, 1 - |cx[i] - c|) == WX[i, c]
        #   wyt[r, i] = max(0, 1 - |cy[i] - r|) == WY[i, r]
        wxt = jnp.maximum(1.0 - jnp.abs(cx - grid_pos), 0.0)      # (N, N) f32
        wyt = jnp.maximum(1.0 - jnp.abs(cy - grid_pos), 0.0)      # (N, N) f32

        xt = x_ref[:, pl.ds(t, 1), :, :]              # (Bb, 1, N, N) bf16
        xt2 = xt.reshape(Bb * N, N)                   # batch fused into MXU rows
        # P[(b, r), i] = sum_c X_b[r, c] * WX[i, c]   (bf16 MXU matmul, f32 acc)
        p = jnp.dot(xt2, wxt.astype(jnp.bfloat16),
                    preferred_element_type=jnp.float32)           # (Bb*N, N) f32
        # out_b[i] = sum_r WY[i, r] * P_b[r, i]       (VPU mul + sublane reduce;
        # wyt stays f32 -- no materialized f32 weight copy, no bf16 rounding)
        row = jnp.sum(p.reshape(Bb, N, N) * wyt[None, :, :], axis=1)   # (Bb, N) f32
        # theta index t is a LEADING (untiled) dim of the output block.
        o_ref[:, :, pl.ds(t, 1), :, :] = row[None, None, None]


# ---------------------------------------------------------------------------
# Tiling / VMEM configuration
# ---------------------------------------------------------------------------
def _vmem_capacity_bytes():
    try:
        info = pltpu.get_tpu_info()
    except Exception:
        return 64 << 20
    for attr in ("vmem_capacity_bytes", "vmem_size_bytes", "vmem_bytes"):
        v = getattr(info, attr, None)
        if isinstance(v, int) and v > 0:
            return v
    return 64 << 20


def _vmem_config():
    cap = _vmem_capacity_bytes()
    if cap >= (96 << 20):          # 128 MiB parts (v5e / v6e): use most of it
        return 80 << 20, 100 << 20
    return 20 << 20, 44 << 20      # 64 MiB parts (v7x) or unknown: stay conservative


def _choose_tiles(B, T, N, block_budget):
    """Pick (batch block Bb, theta tile tt) so one grid step fits the budget."""
    # Batch fusion into the MXU row dim: only when the per-image matmul
    # underfills the 256-wide MXU and the reshape is layout-free (N % 16 == 0).
    if N <= 128 and N % 16 == 0:
        bb_cap = max(1, 256 // N)
        bb_candidates = sorted(
            (d for d in range(1, min(B, bb_cap) + 1) if B % d == 0), reverse=True)
    else:
        bb_candidates = [1]
    divs = [d for d in range(1, T + 1) if T % d == 0]

    def footprint(bb, tt):
        x_blk = 2 * (2 * bb * tt * N * N)                   # bf16 x, double-buffered
        coords_blk = 2 * (tt * 8 * max(N, 128) * 4)         # (tt,2,N) f32, padded
        out_blk = 2 * (tt * max(bb, 8) * max(N, 128) * 4)   # f32 out block, padded
        temps = (12 + 12 * bb) * N * N                      # per-theta live temporaries
        return x_blk + coords_blk + out_blk + temps + (2 << 20)

    Bb = tt = None
    for bb in bb_candidates:
        fitting = [d for d in divs if footprint(bb, d) <= block_budget]
        if fitting:
            Bb, tt = bb, max(fitting)
            break
    if Bb is None:
        # TODO(synk): add an image-dimension (N) tiling fallback for very large inputs.
        raise ValueError(
            f"IStackgram Pallas kernel: a single-theta working set does not fit "
            f"the VMEM budget (N={N}); image tiling is not implemented.")

    # Keep both TensorCores busy on dual-TC parts: prefer >= 2 grid steps.
    if (T // tt) * (B // Bb) < 2:
        if T >= 2:
            tt = max(d for d in divs if d <= T // 2)
        elif B >= 2:
            Bb = max((d for d in range(1, B // 2 + 1) if B % d == 0), default=1)
    return Bb, tt


# ---------------------------------------------------------------------------
# Forward wrapper
# ---------------------------------------------------------------------------
def istackgram_forward(x, theta_deg):
    """x: (B, T, N, N) float32  ->  sinogram (B, 1, N, T) float32."""
    B, T, N, N2 = x.shape
    assert N == N2

    iy, ix = make_sample_coords(theta_deg, N)
    coords = jnp.stack([iy, ix], axis=1).astype(jnp.float32)     # (T, 2, N)
    xb = x.astype(jnp.bfloat16)                                  # halves HBM traffic

    block_budget, vmem_limit = _vmem_config()
    Bb, tt = _choose_tiles(B, T, N, block_budget)
    num_tb = T // tt
    num_bb = B // Bb

    flops = B * T * (2 * N * N * N + 4 * N * N) + T * 8 * N * N
    bytes_accessed = B * T * N * N * 2 + T * 2 * N * 4 + B * T * N * 4

    out = pl.pallas_call(
        istackgram_kernel,
        out_shape=jax.ShapeDtypeStruct((num_bb, num_tb, tt, Bb, N), jnp.float32),
        grid_spec=pltpu.PrefetchScalarGridSpec(
            num_scalar_prefetch=0,
            # theta-block OUTER, batch-block INNER: the coord block keeps the
            # same block index along the inner axis -> DMA'd once per theta block.
            grid=(num_tb, num_bb),
            in_specs=[
                # x is the only operand streamed every step; if profiling shows
                # exposed DMA at small tt, add pipeline_mode=pl.Buffered(3) here.
                pl.BlockSpec((Bb, tt, N, N), lambda tb, b: (b, tb, 0, 0)),
                pl.BlockSpec((tt, 2, N), lambda tb, b: (tb, 0, 0)),
            ],
            out_specs=pl.BlockSpec((1, 1, tt, Bb, N), lambda tb, b: (b, tb, 0, 0, 0)),
        ),
        compiler_params=pltpu.CompilerParams(
            dimension_semantics=("parallel", "parallel"),
            vmem_limit_bytes=vmem_limit),
        cost_estimate=pl.CostEstimate(
            flops=flops, transcendentals=0, bytes_accessed=bytes_accessed),
    )(xb, coords)

    # (num_bb, num_tb, tt, Bb, N) -> (B, T, N) -> (B, 1, N, T)  (torch layout)
    out = jnp.transpose(out, (0, 3, 1, 2, 4)).reshape(B, T, N)
    return jnp.transpose(out, (0, 2, 1))[:, None, :, :]


# ---------------------------------------------------------------------------
# Pure-JAX references for correctness checking
# ---------------------------------------------------------------------------
def istackgram_separable_ref(x, theta_deg):
    """Same separable math / operand dtypes as the kernel (plumbing check)."""
    B, T, N, _ = x.shape
    iy, ix = make_sample_coords(theta_deg, N)                    # (T, N)
    pos = jnp.arange(N, dtype=jnp.float32)
    wy = jnp.maximum(1.0 - jnp.abs(iy[:, :, None] - pos), 0.0)   # (T, i, r)
    wx = jnp.maximum(1.0 - jnp.abs(ix[:, :, None] - pos), 0.0)   # (T, i, c)
    xb = x.astype(jnp.bfloat16)
    p = jnp.einsum('btrc,tic->btri', xb, wx.astype(jnp.bfloat16),
                   preferred_element_type=jnp.float32)           # (B, T, r, i)
    out = jnp.einsum('btri,tir->bti', p, wy)                     # f32 (B, T, i)
    return jnp.transpose(out, (0, 2, 1))[:, None, :, :]


def istackgram_reference(x, theta_deg):
    """Direct f32 bilinear gather (grid_sample semantics, zeros padding)."""
    B, T, N, _ = x.shape
    iy, ix = make_sample_coords(theta_deg, N)
    x0 = jnp.floor(ix).astype(jnp.int32)
    y0 = jnp.floor(iy).astype(jnp.int32)
    x1, y1 = x0 + 1, y0 + 1
    wx1 = ix - x0.astype(jnp.float32)
    wx0 = 1.0 - wx1
    wy1 = iy - y0.astype(jnp.float32)
    wy0 = 1.0 - wy1
    tidx = jnp.arange(T)[:, None]

    def corner(img, yy, xx):                                     # img: (T, N, N)
        valid = (yy >= 0) & (yy < N) & (xx >= 0) & (xx < N)
        yyc = jnp.clip(yy, 0, N - 1)
        xxc = jnp.clip(xx, 0, N - 1)
        return jnp.where(valid, img[tidx, yyc, xxc], 0.0)

    def per_batch(img):
        return (wy0 * wx0 * corner(img, y0, x0)
                + wy0 * wx1 * corner(img, y0, x1)
                + wy1 * wx0 * corner(img, y1, x0)
                + wy1 * wx1 * corner(img, y1, x1))               # (T, N)

    out = jax.vmap(per_batch)(x.astype(jnp.float32))             # (B, T, N)
    return jnp.transpose(out, (0, 2, 1))[:, None, :, :]


if __name__ == "__main__":
    # Small deterministic configuration: out_size=16, circle=True -> in_size=16,
    # 8 projection angles, batch=2.
    B = 2
    out_size = 16
    n_theta = 8
    theta_deg = jnp.arange(n_theta, dtype=jnp.float32) * (180.0 / n_theta)

    key = jax.random.PRNGKey(0)
    x = jax.random.normal(key, (B, n_theta, out_size, out_size), dtype=jnp.float32)

    sino = jax.block_until_ready(istackgram_forward(x, theta_deg))

    assert sino.shape == (B, 1, out_size, n_theta)
    assert sino.dtype == jnp.float32

    # Plumbing check: identical operand dtypes / separable math (tight tol).
    ref_sep = jax.block_until_ready(istackgram_separable_ref(x, theta_deg))
    np.testing.assert_allclose(np.asarray(sino), np.asarray(ref_sep),
                               rtol=2e-3, atol=2e-3)

    # Math check: direct f32 bilinear gather (grid_sample semantics); tolerance
    # loosened only for the bf16 cast of x (weights are f32 in the kernel now).
    ref = jax.block_until_ready(istackgram_reference(x, theta_deg))
    np.testing.assert_allclose(np.asarray(sino), np.asarray(ref),
                               rtol=5e-2, atol=5e-2)

    print("KERNEL_OK")
</pallas_src>

<mosaic_0001>
module attributes {stable_mosaic.version = 11 : i64} {
  func.func @istackgram_kernel(%arg0: i32, %arg1: i32, %arg2: memref<2x4x16x16xbf16, #tpu.memory_space<vmem>>, %arg3: memref<4x2x16xf32, #tpu.memory_space<vmem>>, %arg4: memref<1x1x4x2x16xf32, #tpu.memory_space<vmem>>) attributes {dimension_semantics = [#tpu.dimension_semantics<parallel>, #tpu.dimension_semantics<parallel>], iteration_bounds = array<i64: 2, 1>, scalar_prefetch = 0 : i64, scratch_operands = 0 : i64, tpu.core_type = #tpu.core_type<tc>, window_params = [{transform_indices = @transform_0, window_bounds = array<i64: 2, 4, 16, 16>}, {transform_indices = @transform_1, window_bounds = array<i64: 4, 2, 16>}, {transform_indices = @transform_2, window_bounds = array<i64: 1, 1, 4, 2, 16>}]} {
    %0 = tpu.iota {dimensions = array<i32: 0>} : vector<16x16xi32>
    %1 = arith.sitofp %0 : vector<16x16xi32> to vector<16x16xf32>
    %c0_i32 = arith.constant 0 : i32
    %c1_i32 = arith.constant 1 : i32
    %2 = arith.muli %c0_i32, %c1_i32 : i32
    %c0_i32_0 = arith.constant 0 : i32
    %3 = arith.addi %c0_i32_0, %2 : i32
    %4 = arith.index_cast %3 : i32 to index
    %c0 = arith.constant 0 : index
    %c0_1 = arith.constant 0 : index
    %5 = vector.load %arg3[%4, %c0, %c0_1] : memref<4x2x16xf32, #tpu.memory_space<vmem>>, vector<1x2x16xf32>
    %6 = vector.extract_strided_slice %5 {offsets = [0, 0, 0], sizes = [1, 1, 16], strides = [1, 1, 1]} : vector<1x2x16xf32> to vector<1x1x16xf32>
    %7 = vector.shape_cast %6 : vector<1x1x16xf32> to vector<1x16xf32>
    %8 = vector.extract_strided_slice %5 {offsets = [0, 1, 0], sizes = [1, 1, 16], strides = [1, 1, 1]} : vector<1x2x16xf32> to vector<1x1x16xf32>
    %9 = vector.shape_cast %8 : vector<1x1x16xf32> to vector<1x16xf32>
    %10 = vector.broadcast %9 : vector<1x16xf32> to vector<16x16xf32>
    %11 = arith.subf %10, %1 : vector<16x16xf32>
    %12 = math.absf %11 : vector<16x16xf32>
    %cst = arith.constant 1.000000e+00 : f32
    %13 = vector.broadcast %cst : f32 to vector<16x16xf32>
    %14 = arith.subf %13, %12 : vector<16x16xf32>
    %cst_2 = arith.constant 0.000000e+00 : f32
    %15 = vector.broadcast %cst_2 : f32 to vector<16x16xf32>
    %16 = arith.maximumf %14, %15 : vector<16x16xf32>
    %17 = vector.broadcast %7 : vector<1x16xf32> to vector<16x16xf32>
    %18 = arith.subf %17, %1 : vector<16x16xf32>
    %19 = math.absf %18 : vector<16x16xf32>
    %cst_3 = arith.constant 1.000000e+00 : f32
    %20 = vector.broadcast %cst_3 : f32 to vector<16x16xf32>
    %21 = arith.subf %20, %19 : vector<16x16xf32>
    %cst_4 = arith.constant 0.000000e+00 : f32
    %22 = vector.broadcast %cst_4 : f32 to vector<16x16xf32>
    %23 = arith.maximumf %21, %22 : vector<16x16xf32>
    %c0_5 = arith.constant 0 : index
    %24 = arith.index_cast %3 : i32 to index
    %c0_6 = arith.constant 0 : index
    %c0_7 = arith.constant 0 : index
    %25 = vector.load %arg2[%c0_5, %24, %c0_6, %c0_7] : memref<2x4x16x16xbf16, #tpu.memory_space<vmem>>, vector<2x1x16x16xbf16>
    %26 = vector.shape_cast %25 : vector<2x1x16x16xbf16> to vector<32x16xbf16>
    %27 = arith.truncf %16 : vector<16x16xf32> to vector<16x16xbf16>
    %cst_8 = arith.constant dense<0.000000e+00> : vector<32x16xf32>
    %28 = tpu.matmul %26, %27, %cst_8 {dimension_numbers = #tpu.dot_dimension_numbers<[1], [0], [0], [1], [0, 0, 1, 1], [], []>} : vector<32x16xbf16>, vector<16x16xbf16>, vector<32x16xf32> -> vector<32x16xf32>
    %29 = vector.shape_cast %28 : vector<32x16xf32> to vector<2x16x16xf32>
    %30 = vector.shape_cast %23 : vector<16x16xf32> to vector<1x16x16xf32>
    %31 = vector.broadcast %30 : vector<1x16x16xf32> to vector<2x16x16xf32>
    %32 = arith.mulf %29, %31 : vector<2x16x16xf32>
    %cst_9 = arith.constant dense<0.000000e+00> : vector<2x16xf32>
    %33 = vector.multi_reduction <add>, %32, %cst_9 [1] : vector<2x16x16xf32> to vector<2x16xf32>
    %34 = vector.shape_cast %33 : vector<2x16xf32> to vector<1x1x1x2x16xf32>
    %c0_10 = arith.constant 0 : index
    %c0_11 = arith.constant 0 : index
    %35 = arith.index_cast %3 : i32 to index
    %c0_12 = arith.constant 0 : index
    %c0_13 = arith.constant 0 : index
    %36 = vector.load %arg4[%c0_10, %c0_11, %35, %c0_12, %c0_13] : memref<1x1x4x2x16xf32, #tpu.memory_space<vmem>>, vector<1x1x1x2x16xf32>
    tpu.vector_store %arg4[%c0_10, %c0_11, %35, %c0_12, %c0_13], %34 {strides = array<i32>} : memref<1x1x4x2x16xf32, #tpu.memory_space<vmem>>, vector<1x1x1x2x16xf32>,
    %c1_i32_14 = arith.constant 1 : i32
    %c1_i32_15 = arith.constant 1 : i32
    %37 = arith.muli %c1_i32_14, %c1_i32_15 : i32
    %c0_i32_16 = arith.constant 0 : i32
    %38 = arith.addi %c0_i32_16, %37 : i32
    %39 = arith.index_cast %38 : i32 to index
    %c0_17 = arith.constant 0 : index
    %c0_18 = arith.constant 0 : index
    %40 = vector.load %arg3[%39, %c0_17, %c0_18] : memref<4x2x16xf32, #tpu.memory_space<vmem>>, vector<1x2x16xf32>
    %41 = vector.extract_strided_slice %40 {offsets = [0, 0, 0], sizes = [1, 1, 16], strides = [1, 1, 1]} : vector<1x2x16xf32> to vector<1x1x16xf32>
    %42 = vector.shape_cast %41 : vector<1x1x16xf32> to vector<1x16xf32>
    %43 = vector.extract_strided_slice %40 {offsets = [0, 1, 0], sizes = [1, 1, 16], strides = [1, 1, 1]} : vector<1x2x16xf32> to vector<1x1x16xf32>
    %44 = vector.shape_cast %43 : vector<1x1x16xf32> to vector<1x16xf32>
    %45 = vector.broadcast %44 : vector<1x16xf32> to vector<16x16xf32>
    %46 = arith.subf %45, %1 : vector<16x16xf32>
    %47 = math.absf %46 : vector<16x16xf32>
    %cst_19 = arith.constant 1.000000e+00 : f32
    %48 = vector.broadcast %cst_19 : f32 to vector<16x16xf32>
    %49 = arith.subf %48, %47 : vector<16x16xf32>
    %cst_20 = arith.constant 0.000000e+00 : f32
    %50 = vector.broadcast %cst_20 : f32 to vector<16x16xf32>
    %51 = arith.maximumf %49, %50 : vector<16x16xf32>
    %52 = vector.broadcast %42 : vector<1x16xf32> to vector<16x16xf32>
    %53 = arith.subf %52, %1 : vector<16x16xf32>
    %54 = math.absf %53 : vector<16x16xf32>
    %cst_21 = arith.constant 1.000000e+00 : f32
    %55 = vector.broadcast %cst_21 : f32 to vector<16x16xf32>
    %56 = arith.subf %55, %54 : vector<16x16xf32>
    %cst_22 = arith.constant 0.000000e+00 : f32
    %57 = vector.broadcast %cst_22 : f32 to vector<16x16xf32>
    %58 = arith.maximumf %56, %57 : vector<16x16xf32>
    %c0_23 = arith.constant 0 : index
    %59 = arith.index_cast %38 : i32 to index
    %c0_24 = arith.constant 0 : index
    %c0_25 = arith.constant 0 : index
    %60 = vector.load %arg2[%c0_23, %59, %c0_24, %c0_25] : memref<2x4x16x16xbf16, #tpu.memory_space<vmem>>, vector<2x1x16x16xbf16>
    %61 = vector.shape_cast %60 : vector<2x1x16x16xbf16> to vector<32x16xbf16>
    %62 = arith.truncf %51 : vector<16x16xf32> to vector<16x16xbf16>
    %cst_26 = arith.constant dense<0.000000e+00> : vector<32x16xf32>
    %63 = tpu.matmul %61, %62, %cst_26 {dimension_numbers = #tpu.dot_dimension_numbers<[1], [0], [0], [1], [0, 0, 1, 1], [], []>} : vector<32x16xbf16>, vector<16x16xbf16>, vector<32x16xf32> -> vector<32x16xf32>
    %64 = vector.shape_cast %63 : vector<32x16xf32> to vector<2x16x16xf32>
    %65 = vector.shape_cast %58 : vector<16x16xf32> to vector<1x16x16xf32>
    %66 = vector.broadcast %65 : vector<1x16x16xf32> to vector<2x16x16xf32>
    %67 = arith.mulf %64, %66 : vector<2x16x16xf32>
    %cst_27 = arith.constant dense<0.000000e+00> : vector<2x16xf32>
    %68 = vector.multi_reduction <add>, %67, %cst_27 [1] : vector<2x16x16xf32> to vector<2x16xf32>
    %69 = vector.shape_cast %68 : vector<2x16xf32> to vector<1x1x1x2x16xf32>
    %c0_28 = arith.constant 0 : index
    %c0_29 = arith.constant 0 : index
    %70 = arith.index_cast %38 : i32 to index
    %c0_30 = arith.constant 0 : index
    %c0_31 = arith.constant 0 : index
    %71 = vector.load %arg4[%c0_28, %c0_29, %70, %c0_30, %c0_31] : memref<1x1x4x2x16xf32, #tpu.memory_space<vmem>>, vector<1x1x1x2x16xf32>
    tpu.vector_store %arg4[%c0_28, %c0_29, %70, %c0_30, %c0_31], %69 {strides = array<i32>} : memref<1x1x4x2x16xf32, #tpu.memory_space<vmem>>, vector<1x1x1x2x16xf32>,
    %c2_i32 = arith.constant 2 : i32
    %c1_i32_32 = arith.constant 1 : i32
    %72 = arith.muli %c2_i32, %c1_i32_32 : i32
    %c0_i32_33 = arith.constant 0 : i32
    %73 = arith.addi %c0_i32_33, %72 : i32
    %74 = arith.index_cast %73 : i32 to index
    %c0_34 = arith.constant 0 : index
    %c0_35 = arith.constant 0 : index
    %75 = vector.load %arg3[%74, %c0_34, %c0_35] : memref<4x2x16xf32, #tpu.memory_space<vmem>>, vector<1x2x16xf32>
    %76 = vector.extract_strided_slice %75 {offsets = [0, 0, 0], sizes = [1, 1, 16], strides = [1, 1, 1]} : vector<1x2x16xf32> to vector<1x1x16xf32>
    %77 = vector.shape_cast %76 : vector<1x1x16xf32> to vector<1x16xf32>
    %78 = vector.extract_strided_slice %75 {offsets = [0, 1, 0], sizes = [1, 1, 16], strides = [1, 1, 1]} : vector<1x2x16xf32> to vector<1x1x16xf32>
    %79 = vector.shape_cast %78 : vector<1x1x16xf32> to vector<1x16xf32>
    %80 = vector.broadcast %79 : vector<1x16xf32> to vector<16x16xf32>
    %81 = arith.subf %80, %1 : vector<16x16xf32>
    %82 = math.absf %81 : vector<16x16xf32>
    %cst_36 = arith.constant 1.000000e+00 : f32
    %83 = vector.broadcast %cst_36 : f32 to vector<16x16xf32>
    %84 = arith.subf %83, %82 : vector<16x16xf32>
    %cst_37 = arith.constant 0.000000e+00 : f32
    %85 = vector.broadcast %cst_37 : f32 to vector<16x16xf32>
    %86 = arith.maximumf %84, %85 : vector<16x16xf32>
    %87 = vector.broadcast %77 : vector<1x16xf32> to vector<16x16xf32>
    %88 = arith.subf %87, %1 : vector<16x16xf32>
    %89 = math.absf %88 : vector<16x16xf32>
    %cst_38 = arith.constant 1.000000e+00 : f32
    %90 = vector.broadcast %cst_38 : f32 to vector<16x16xf32>
    %91 = arith.subf %90, %89 : vector<16x16xf32>
    %cst_39 = arith.constant 0.000000e+00 : f32
    %92 = vector.broadcast %cst_39 : f32 to vector<16x16xf32>
    %93 = arith.maximumf %91, %92 : vector<16x16xf32>
    %c0_40 = arith.constant 0 : index
    %94 = arith.index_cast %73 : i32 to index
    %c0_41 = arith.constant 0 : index
    %c0_42 = arith.constant 0 : index
    %95 = vector.load %arg2[%c0_40, %94, %c0_41, %c0_42] : memref<2x4x16x16xbf16, #tpu.memory_space<vmem>>, vector<2x1x16x16xbf16>
    %96 = vector.shape_cast %95 : vector<2x1x16x16xbf16> to vector<32x16xbf16>
    %97 = arith.truncf %86 : vector<16x16xf32> to vector<16x16xbf16>
    %cst_43 = arith.constant dense<0.000000e+00> : vector<32x16xf32>
    %98 = tpu.matmul %96, %97, %cst_43 {dimension_numbers = #tpu.dot_dimension_numbers<[1], [0], [0], [1], [0, 0, 1, 1], [], []>} : vector<32x16xbf16>, vector<16x16xbf16>, vector<32x16xf32> -> vector<32x16xf32>
    %99 = vector.shape_cast %98 : vector<32x16xf32> to vector<2x16x16xf32>
    %100 = vector.shape_cast %93 : vector<16x16xf32> to vector<1x16x16xf32>
    %101 = vector.broadcast %100 : vector<1x16x16xf32> to vector<2x16x16xf32>
    %102 = arith.mulf %99, %101 : vector<2x16x16xf32>
    %cst_44 = arith.constant dense<0.000000e+00> : vector<2x16xf32>
    %103 = vector.multi_reduction <add>, %102, %cst_44 [1] : vector<2x16x16xf32> to vector<2x16xf32>
    %104 = vector.shape_cast %103 : vector<2x16xf32> to vector<1x1x1x2x16xf32>
    %c0_45 = arith.constant 0 : index
    %c0_46 = arith.constant 0 : index
    %105 = arith.index_cast %73 : i32 to index
    %c0_47 = arith.constant 0 : index
    %c0_48 = arith.constant 0 : index
    %106 = vector.load %arg4[%c0_45, %c0_46, %105, %c0_47, %c0_48] : memref<1x1x4x2x16xf32, #tpu.memory_space<vmem>>, vector<1x1x1x2x16xf32>
    tpu.vector_store %arg4[%c0_45, %c0_46, %105, %c0_47, %c0_48], %104 {strides = array<i32>} : memref<1x1x4x2x16xf32, #tpu.memory_space<vmem>>, vector<1x1x1x2x16xf32>,
    %c3_i32 = arith.constant 3 : i32
    %c1_i32_49 = arith.constant 1 : i32
    %107 = arith.muli %c3_i32, %c1_i32_49 : i32
    %c0_i32_50 = arith.constant 0 : i32
    %108 = arith.addi %c0_i32_50, %107 : i32
    %109 = arith.index_cast %108 : i32 to index
    %c0_51 = arith.constant 0 : index
    %c0_52 = arith.constant 0 : index
    %110 = vector.load %arg3[%109, %c0_51, %c0_52] : memref<4x2x16xf32, #tpu.memory_space<vmem>>, vector<1x2x16xf32>
    %111 = vector.extract_strided_slice %110 {offsets = [0, 0, 0], sizes = [1, 1, 16], strides = [1, 1, 1]} : vector<1x2x16xf32> to vector<1x1x16xf32>
    %112 = vector.shape_cast %111 : vector<1x1x16xf32> to vector<1x16xf32>
    %113 = vector.extract_strided_slice %110 {offsets = [0, 1, 0], sizes = [1, 1, 16], strides = [1, 1, 1]} : vector<1x2x16xf32> to vector<1x1x16xf32>
    %114 = vector.shape_cast %113 : vector<1x1x16xf32> to vector<1x16xf32>
    %115 = vector.broadcast %114 : vector<1x16xf32> to vector<16x16xf32>
    %116 = arith.subf %115, %1 : vector<16x16xf32>
    %117 = math.absf %116 : vector<16x16xf32>
    %cst_53 = arith.constant 1.000000e+00 : f32
    %118 = vector.broadcast %cst_53 : f32 to vector<16x16xf32>
    %119 = arith.subf %118, %117 : vector<16x16xf32>
    %cst_54 = arith.constant 0.000000e+00 : f32
    %120 = vector.broadcast %cst_54 : f32 to vector<16x16xf32>
    %121 = arith.maximumf %119, %120 : vector<16x16xf32>
    %122 = vector.broadcast %112 : vector<1x16xf32> to vector<16x16xf32>
    %123 = arith.subf %122, %1 : vector<16x16xf32>
    %124 = math.absf %123 : vector<16x16xf32>
    %cst_55 = arith.constant 1.000000e+00 : f32
    %125 = vector.broadcast %cst_55 : f32 to vector<16x16xf32>
    %126 = arith.subf %125, %124 : vector<16x16xf32>
    %cst_56 = arith.constant 0.000000e+00 : f32
    %127 = vector.broadcast %cst_56 : f32 to vector<16x16xf32>
    %128 = arith.maximumf %126, %127 : vector<16x16xf32>
    %c0_57 = arith.constant 0 : index
    %129 = arith.index_cast %108 : i32 to index
    %c0_58 = arith.constant 0 : index
    %c0_59 = arith.constant 0 : index
    %130 = vector.load %arg2[%c0_57, %129, %c0_58, %c0_59] : memref<2x4x16x16xbf16, #tpu.memory_space<vmem>>, vector<2x1x16x16xbf16>
    %131 = vector.shape_cast %130 : vector<2x1x16x16xbf16> to vector<32x16xbf16>
    %132 = arith.truncf %121 : vector<16x16xf32> to vector<16x16xbf16>
    %cst_60 = arith.constant dense<0.000000e+00> : vector<32x16xf32>
    %133 = tpu.matmul %131, %132, %cst_60 {dimension_numbers = #tpu.dot_dimension_numbers<[1], [0], [0], [1], [0, 0, 1, 1], [], []>} : vector<32x16xbf16>, vector<16x16xbf16>, vector<32x16xf32> -> vector<32x16xf32>
    %134 = vector.shape_cast %133 : vector<32x16xf32> to vector<2x16x16xf32>
    %135 = vector.shape_cast %128 : vector<16x16xf32> to vector<1x16x16xf32>
    %136 = vector.broadcast %135 : vector<1x16x16xf32> to vector<2x16x16xf32>
    %137 = arith.mulf %134, %136 : vector<2x16x16xf32>
    %cst_61 = arith.constant dense<0.000000e+00> : vector<2x16xf32>
    %138 = vector.multi_reduction <add>, %137, %cst_61 [1] : vector<2x16x16xf32> to vector<2x16xf32>
    %139 = vector.shape_cast %138 : vector<2x16xf32> to vector<1x1x1x2x16xf32>
    %c0_62 = arith.constant 0 : index
    %c0_63 = arith.constant 0 : index
    %140 = arith.index_cast %108 : i32 to index
    %c0_64 = arith.constant 0 : index
    %c0_65 = arith.constant 0 : index
    %141 = vector.load %arg4[%c0_62, %c0_63, %140, %c0_64, %c0_65] : memref<1x1x4x2x16xf32, #tpu.memory_space<vmem>>, vector<1x1x1x2x16xf32>
    tpu.vector_store %arg4[%c0_62, %c0_63, %140, %c0_64, %c0_65], %139 {strides = array<i32>} : memref<1x1x4x2x16xf32, #tpu.memory_space<vmem>>, vector<1x1x1x2x16xf32>,
    %c4_i32 = arith.constant 4 : i32
    return
  }
  func.func @transform_0(%arg0: i32, %arg1: i32) -> (i32, i32, i32, i32) {
    %c0_i32 = arith.constant 0 : i32
    %c0_i32_0 = arith.constant 0 : i32
    %c0_i32_1 = arith.constant 0 : i32
    return %arg1, %arg0, %c0_i32, %c0_i32_0 : i32, i32, i32, i32
  }
  func.func @transform_1(%arg0: i32, %arg1: i32) -> (i32, i32, i32) {
    %c0_i32 = arith.constant 0 : i32
    %c0_i32_0 = arith.constant 0 : i32
    %c0_i32_1 = arith.constant 0 : i32
    return %arg0, %c0_i32, %c0_i32_0 : i32, i32, i32
  }
  func.func @transform_2(%arg0: i32, %arg1: i32) -> (i32, i32, i32, i32, i32) {
    %c0_i32 = arith.constant 0 : i32
    %c0_i32_0 = arith.constant 0 : i32
    %c0_i32_1 = arith.constant 0 : i32
    %c0_i32_2 = arith.constant 0 : i32
    return %arg1, %arg0, %c0_i32, %c0_i32_0, %c0_i32_1 : i32, i32, i32, i32, i32
  }
}

</mosaic_0001>

<bundles_post_ra>
// kernel: tpu_custom_call.1
= control target key start
LH: loop header
LB: loop body
LE: loop exit
PB: predicated region body
PF: predicated region fallthrough
CT: control target
= control target key end

     0   :  { %7 = vsyncpa [#allocation3], 0  ;;  %s1480_s0 = inlined_call_operand.hbm [shape: bf16[2,8,16,16], index: 0, kind: input, shape index: {}]   ;;  %s1481_s1 = inlined_call_operand.hbm [shape: f32[8,2,16], index: 1, kind: input, shape index: {}]   ;;  %s1482_s2 = inlined_call_operand.hbm [shape: f32[1,2,4,2,16], index: 2, kind: output, shape index: {}]  }
   0x1   :  { %9 = vsyncpa [#allocation3 + $0x1], 0 }
   0x2   :  { %10 = vsyncpa [#allocation6], 0 }
   0x3   :  { %12 = vsyncpa [#allocation6 + $0x1], 0 }
   0x4   :  { %13 = vsyncpa [#allocation4], 0 }
   0x5   :  { %15 = vsyncpa [#allocation4 + $0x1], 0  ;;  %s1205_s9 = smov 0   ;;  %s1207_s10 = smov 0  }
   0x6   :  { %s1209_s11 = smov 0   ;;  %s1211_s12 = smov 0  }
   0x7   :  { %s1213_s13 = smov 0   ;;  %s1215_s14 = smov 0  }
   0x8 LB: > { %s882_s15 = sadd.s32 4294967295, %s1176_s14   ;;  %s883_s16 = sadd.s32 4294967294, %s1176_s14   ;;  %s1176_s14 = sphi %s1215_s14, %s21_s14   ;;  %s1172_s13 = sphi %s1213_s13, %s1496_s13   ;;  %s1168_s12 = sphi %s1211_s12, %s1495_s12   ;;  %s1164_s11 = sphi %s1209_s11, %s1494_s11   ;;  %s1160_s10 = sphi %s1207_s10, %s1493_s10   ;;  %s1156_s9 = sphi %s1205_s9, %s1492_s9  }
   0x9   : > { %s33_s17 = sadd.s32 1, %s1172_s13  ;;  %s42_s18 = sadd.s32 1, %s1164_s11 }
   0xa   : > { %p35_p0 = scmp.ge.s32.totalorder %s33_s17, 2  ;;  %p49_p1 = scmp.ne.s32.totalorder %s1164_s11, %s1160_s10 }
   0xb   : > { %p50_p2 = scmp.eq.s32.totalorder %s1176_s14, 0  ;;  %p55_p3 = scmp.ne.s32.totalorder %s1160_s10, %s1156_s9 }
   0xc   : > { %s1498_s17 = smov (%p35_p0, %s33_s17), 0  ;;  %p56_p5 = scmp.eq.s32.totalorder %s882_s15, 0 }
   0xd   : > { %p1246_p4 = por %p50_p2, %p49_p1  ;;  %s38_s20 = ssub.s32 %s1172_s13, %s1498_s17 }
   0xe   : > { %p107_p6 = scmp.eq.s32.totalorder %s882_s15, 1  ;;  %p40_p7 = scmp.eq.s32.totalorder %s38_s20, 0 }
   0xf   : > { %p1252_p8 = por %p56_p5, %p55_p3  ;;  %p113_p10 = scmp.eq.s32.totalorder %s883_s16, 1 }
  0x10   : > { %p1256_p9 = por %p107_p6, %p49_p1  ;;  %p1483_p12 = scmp.ge.s32.totalorder %s1176_s14, 2 }
  0x11   : > { %s1261_s23 = scalar_select %p40_p7, %s1164_s11, %s42_s18  }
  0x12   : > { %s1487_s22 = scalar_select %p1256_p9, 1, 0 }
  0x13   : > { %p1263_p11 = por %p113_p10, %p55_p3  ;;  %129 = sbr.rel (%p1483_p12) target bundleno = 65 (0x41), region = 16 }
  0x15   : > { %s1488_s24 = scalar_select %p1263_p11, 1, 0 }
  0x1a   : > { %s1271_s25 = sand.u32 1, %s1164_s11   ;;  %s939_s26 = sshll.u32 %s1172_s13, 9 }
  0x1b   : > { %s886_s27 = sshll.u32 %s1271_s25, 6  ;;  %s147_s30 = scalar_lea.hbm %s1480_s0, %s939_s26 }
  0x1c   : > { %s978_s3 = scalar_select %p1246_p4, [#allocation0], [#allocation10] }
  0x1d   : > { %s137_s4 = scalar_lea.vmem [#allocation2], %s886_s27  ;;  %s1178_s7 = smov 1024  }
  0x1e   : > { %s160_s5 = sshll.u32 %s137_s4, 4  ;;  %s152_s6 = sld [smem:[%s978_s3]]   ;;  %s161_s5 = int_to_ptr.vmem [resolvable:$true] %s160_s5 }
  0x1f   : > { %979 = sst [smem:[#allocation9]] (%p1246_p4), %s1178_s7  ;;  %s1179_s8 = smov 512  }
  0x20   : > { %980 = sst [smem:[#allocation9 + $0x1]] (%p1246_p4), %s1179_s8  ;;  %s1180_s15 = smov 8  }
  0x21   : > { %981 = sst [smem:[#allocation9 + $0x2]] (%p1246_p4), %s1180_s15  ;;  %s1181_s16 = smov 64  }
  0x22   : > { %982 = sst [smem:[#allocation9 + $0x3]] (%p1246_p4), %s1181_s16  ;;  %s1182_s20 = smov 4  }
  0x23   : > { %983 = sst [smem:[#allocation9 + $0x4]] (%p1246_p4), %s1181_s16  ;;  %s134_s27 = scalar_lea.sflag [#allocation3], %s1271_s25 }
  0x24   : > { %s890_s18 = sshll.u32 %s152_s6, 26  ;;  %984 = sst [smem:[#allocation9 + $0x5]] (%p1246_p4), %s1182_s20 }
  0x25   : > { %s891_s26 = sadd.s32 134217728, %s890_s18  ;;  %s1183_s28 = smov [#allocation8]  }
  0x26   : > { %985 = dma.general (%p1246_p4), %s147_s30, 1024, %s161_s5, %s134_s27, %s1183_s28, [#allocation9], %s891_s26, 0  }
  0x27   : > { %s892_s29 = sshll.u32 %s1271_s25, 3  ;;  %s940_s3 = sshll.u32 %s1172_s13, 7 }
  0x28   : > { %s1300_s8 = scalar_lea.hbm %s1481_s1, %s940_s3  ;;  %s187_s6 = scalar_lea.vmem [#allocation5], %s892_s29 }
  0x29   : > { %s194_s15 = sshll.u32 %s187_s6, 4  ;;  %s184_s30 = scalar_lea.sflag [#allocation6], %s1271_s25  ;;  %s1302_s15 = int_to_ptr.vmem [resolvable:$true] %s194_s15 }
  0x2a   : > { %s1062_s5 = scalar_lea.hbm %s1300_s8, 128  ;;  %s1066_s20 = scalar_lea.hbm %s1481_s1, 256 }
  0x2b   : > { %p1063_p13 = scmp.ne.s32.totalorder %s1300_s8, %s1062_s5  ;;  %p1067_p2 = scmp.lt.u32.totalorder %s1300_s8, %s1481_s1 }
  0x2c   : > { %p1068_p3 = scmp.lt.u32.totalorder %s1066_s20, %s1062_s5  ;;  %p1070_p6 = scmp.lt.u32.totalorder %s1062_s5, %s1300_s8 }
  0x2d   : > { %p1064_p0 = pnand %p1063_p13, %p1246_p4 }
  0x2e   : > { %p1069_p5 = por %p1068_p3, %p1067_p2 }
  0x2f   : > { %p1065_p1 = pneg %p1064_p0 }
  0x30   : > { %p1071_p7 = por %p1070_p6, %p1069_p5 }
  0x32   : > { %p1072_p10 = pnand %p1071_p7, %p1065_p1 }
  0x34   : > { %1075 = shalt.err (!%p1072_p10)
}
  0x35   : > { %s1076_s28 = scalar_lea.vmem %s1302_s15, 128  ;;  %s1184_s29 = smov [#allocation5]  }
  0x36   : > { %p1077_p13 = scmp.ne.s32.totalorder %s1302_s15, %s1076_s28  ;;  %s1080_s3 = sshll.u32 %s1184_s29, 4  ;;  %s1081_s3 = int_to_ptr.vmem [resolvable:$false] %s1080_s3 }
  0x37   : > { %s1082_s4 = scalar_lea.vmem %s1081_s3, 256  ;;  %p1083_p11 = scmp.lt.s32.totalorder %s1302_s15, %s1081_s3 }
  0x38   : > { %p1078_p0 = pnand %p1077_p13, %p1246_p4  ;;  %p1084_p9 = scmp.lt.s32.totalorder %s1082_s4, %s1076_s28 }
  0x3a   : > { %p1079_p12 = pneg %p1078_p0  ;;  %p1085_p2 = por %p1084_p9, %p1083_p11 }
  0x3c   : > { %p1086_p3 = pnand %p1085_p2, %p1079_p12 }
  0x3e   : > { %1089 = shalt.err (!%p1086_p3)
}
  0x3f   : > { %s1185_s7 = smov 32   ;;  %s1186_s6 = smov 2  }
  0x40   : > { %986 = dma.hbm_to_vmem [thread:$0]  (%p1246_p4), %s1300_s8, 128, %s1302_s15, %s184_s30, %s1185_s7, %s1185_s7, %s1186_s6  }
  0x41 PF: > { %p895_p1 = scmp.ge.s32.totalorder %s1176_s14, 1  ;;  %p202_p5 = scmp.lt.s32.totalorder %s1176_s14, 3 }
  0x43   : > { %p203_p6 = pnand %p895_p1, %p202_p5 }
  0x44   : > { %s1331_s5 = sand.u32 (!%p203_p6), 1, %s1160_s10  }
  0x45   : > { %206 = sbr.rel (%p203_p6) target bundleno = 363 (0x16b), region = 28  ;;  %s896_s16 = sshll.u32 (!%p203_p6), %s1331_s5, 6 }
  0x46   : > { %s209_s18 = scalar_lea.sflag (!%p203_p6), [#allocation3], %s1331_s5  ;;  %s1335_s20 = scalar_lea.vmem (!%p203_p6), [#allocation2], %s896_s16 }
  0x4c   : > { %1143 = dma.done.wait (%p1252_p8), %s209_s18, 1024  }
  0x4d   : > { %1145 = vsyncadd (%p1252_p8), %s209_s18, 4294966272  ;;  %s897_s19 = sshll.u32 %s1331_s5, 3  ;;  %s218_s25 = scalar_lea.sflag [#allocation6], %s1331_s5 }
  0x4e   : > { %s221_s8 = scalar_lea.vmem [#allocation5], %s897_s19 }
  0x4f   : > { %1147 = dma.done.wait (%p1252_p8), %s218_s25, 128  }
  0x50   : > { %1149 = vsyncadd (%p1252_p8), %s218_s25, 4294967168  ;;  %v251_v0 = vlaneseq  ;;  %vm296_vm0 = vcmask 130048   ;;  %v256_v7 = vld [vmem:[%s221_s8] sm:$0x3]  ;;  %v1355_v8 = vld [vmem:[%s221_s8 + $0x2] sm:$0x3] }
  0x51   : > { %v1054_v11 = vld [vmem:[%s1335_s20] sm:$0xff]   ;;  %v1055_v13 = vld [vmem:[%s1335_s20 + $0x8] sm:$0xff]   ;;  %v1058_v52 = vld [vmem:[%s1335_s20 + $0x10] sm:$0xff]   ;;  %vm376_vm1 = vcmask 1041409   ;;  %vm379_vm2 = vcmask 123904   ;;  %s246_s21 = scalar_lea.vmem [#allocation7], %s897_s19 }
  0x52   : > { %v252_v1 = vshrl.u32 %v251_v0, 7  ;;  %956 = vmatprep.mubr.msk.bf16.mxu0 %vm296_vm0, %v1054_v11  ;;  %962 = vmatprep.mubr.msk.bf16.mxu1 %vm296_vm0, %v1055_v13  ;;  %v913_v18 = vld [vmem:[%s221_s8 + $0x4] sm:$0x3]  ;;  %v923_v24 = vld [vmem:[%s221_s8 + $0x6] sm:$0x3]  ;;  %v1059_v56 = vld [vmem:[%s1335_s20 + $0x18] sm:$0xff]  }
  0x53   : > { %v1056_v46 = vld [vmem:[%s1335_s20 + $0x20] sm:$0xff]   ;;  %v1057_v48 = vld [vmem:[%s1335_s20 + $0x28] sm:$0xff]   ;;  %v1060_v58 = vld [vmem:[%s1335_s20 + $0x30] sm:$0xff]   ;;  %s941_s15 = sshll.u32 %s1168_s12, 7  ;;  %s772_s30 = sshll.u32 %s246_s21, 4  ;;  %s1428_s30 = int_to_ptr.vmem [resolvable:$true] %s772_s30 }
  0x54   : > { %v253_v2 = vadd.s32 8, %v252_v1  ;;  %v259_v3 = vsub.s32 1, %v252_v1  ;;  %v1349_v4 = vsub.s32 0, %v252_v1  ;;  %v1351_v5 = vcvt.s32.f32 %v252_v1  ;;  %v1061_v59 = vld [vmem:[%s1335_s20 + $0x38] sm:$0xff]   ;;  %s1426_s28 = scalar_lea.hbm %s1482_s2, %s941_s15  ;;  %s757_s12 = scalar_lea.sflag [#allocation4], %s1331_s5 }
  0x55   : > { %s1090_s29 = scalar_lea.vmem %s1428_s30, 128  ;;  %p1489_p8 = scmp.ne.s32.totalorder %s1487_s22, 0 }
  0x56   : > { %v1353_v6 = vcvt.s32.f32 %v253_v2  ;;  %v260_v9 = vrot.slane %v256_v7, %v259_v3  ;;  %v386_v10 = vrot.slane %v1355_v8, %v259_v3  ;;  %v1360_v12 = vrot.slane %v256_v7, %v1349_v4  ;;  %p1091_p4 = scmp.ne.s32.totalorder %s1428_s30, %s1090_s29  ;;  %s1187_s3 = smov [#allocation7]  }
  0x57   : > { %v511_v22 = vrot.slane %v913_v18, %v259_v3  ;;  %v636_v31 = vrot.slane %v923_v24, %v259_v3  ;;  %v398_v60 = vrot.slane %v1355_v8, %v1349_v4  ;;  %v523_v0 = vrot.slane %v913_v18, %v1349_v4  ;;  %s1094_s4 = sshll.u32 %s1187_s3, 4  ;;  %s1095_s4 = int_to_ptr.vmem [resolvable:$false] %s1094_s4 }
  0x58   : > { %v261_v14 = vsub.f32 %v260_v9, %v1351_v5  ;;  %v262_v15 = vsub.f32 %v260_v9, %v1353_v6  ;;  %v387_v16 = vsub.f32 %v386_v10, %v1351_v5  ;;  %v388_v17 = vsub.f32 %v386_v10, %v1353_v6  ;;  %p1092_p9 = pnand %p1091_p4, %p1489_p8  ;;  %s1096_s7 = scalar_lea.vmem %s1095_s4, 256 }
  0x59   : > { %v512_v28 = vsub.f32 %v511_v22, %v1351_v5  ;;  %v513_v30 = vsub.f32 %v511_v22, %v1353_v6  ;;  %v637_v38 = vsub.f32 %v636_v31, %v1351_v5  ;;  %v638_v39 = vsub.f32 %v636_v31, %v1353_v6  ;;  %p1097_p12 = scmp.lt.s32.totalorder %s1428_s30, %s1095_s4  ;;  %p1098_p7 = scmp.lt.s32.totalorder %s1096_s7, %s1090_s29 }
  0x5a   : > { %v263_v19 = vand.u32 2147483647, %v261_v14  ;;  %v264_v20 = vand.u32 2147483647, %v262_v15  ;;  %v389_v21 = vand.u32 2147483647, %v387_v16  ;;  %v273_v61 = vsub.f32 %v1360_v12, %v1351_v5  ;;  %p1093_p11 = pneg %p1092_p9 }
  0x5b   : > { %v390_v23 = vand.u32 2147483647, %v388_v17  ;;  %v514_v35 = vand.u32 2147483647, %v512_v28  ;;  %v515_v37 = vand.u32 2147483647, %v513_v30  ;;  %v399_v62 = vsub.f32 %v398_v60, %v1351_v5  ;;  %p1099_p10 = por %p1098_p7, %p1097_p12 }
  0x5c   : > { %v265_v25 = vsub.f32 1.0, %v263_v19  ;;  %v266_v26 = vsub.f32 1.0, %v264_v20  ;;  %v391_v27 = vsub.f32 1.0, %v389_v21  ;;  %v639_v44 = vand.u32 2147483647, %v637_v38 }
  0x5d   : > { %v392_v29 = vsub.f32 1.0, %v390_v23  ;;  %v516_v41 = vsub.f32 1.0, %v514_v35  ;;  %v517_v43 = vsub.f32 1.0, %v515_v37  ;;  %v640_v45 = vand.u32 2147483647, %v638_v39  ;;  %p1100_p13 = pnand %p1099_p10, %p1093_p11 }
  0x5e   : > { %v267_v32 = vmax.f32 %v265_v25, 0.0  ;;  %v268_v33 = vmax.f32 %v266_v26, 0.0  ;;  %v393_v34 = vmax.f32 %v391_v27, 0.0  ;;  %v641_v50 = vsub.f32 1.0, %v639_v44 }
  0x5f   : > { %v394_v36 = vmax.f32 %v392_v29, 0.0  ;;  %v518_v47 = vmax.f32 %v516_v41, 0.0  ;;  %v519_v49 = vmax.f32 %v517_v43, 0.0  ;;  %v642_v51 = vsub.f32 1.0, %v640_v45 }
  0x60   : > { %v285_v40 = vpack.c.bf16 %v268_v33, %v267_v32  ;;  %v643_v54 = vmax.f32 %v641_v50, 0.0  ;;  %v274_v63 = vsub.f32 %v1360_v12, %v1353_v6  ;;  %v400_v1 = vsub.f32 %v398_v60, %v1353_v6 }
  0x61   : > { %v412_v42 = vpack.c.bf16 %v394_v36, %v393_v34  ;;  %v537_v53 = vpack.c.bf16 %v519_v49, %v518_v47  ;;  %v644_v55 = vmax.f32 %v642_v51, 0.0  ;;  %v648_v2 = vrot.slane %v923_v24, %v1349_v4 }
  0x62   : > { %954 = vmatprep.subr.bf16.mxu0 %v285_v40  ;;  %v275_v3 = vand.u32 2147483647, %v273_v61  ;;  %v401_v7 = vand.u32 2147483647, %v399_v62  ;;  %v276_v9 = vand.u32 2147483647, %v274_v63  ;;  %v524_v10 = vsub.f32 %v523_v0, %v1351_v5 }
  0x63   : > { %960 = vmatprep.subr.bf16.mxu1 %v412_v42  ;;  %955 = vmatpush3.bf16.msra.mxu0 %v285_v40  ;;  %v662_v57 = vpack.c.bf16 %v644_v55, %v643_v54  ;;  %v402_v8 = vand.u32 2147483647, %v400_v1  ;;  %v649_v11 = vsub.f32 %v648_v2, %v1351_v5  ;;  %v525_v12 = vsub.f32 %v523_v0, %v1353_v6 }
  0x64   : > { %961 = vmatpush3.bf16.msra.mxu1 %v412_v42  ;;  %966 = vmatprep.subr.bf16.mxu0 %v537_v53  ;;  %v277_v13 = vsub.f32 1.0, %v275_v3  ;;  %v403_v14 = vsub.f32 1.0, %v401_v7  ;;  %v278_v15 = vsub.f32 1.0, %v276_v9  ;;  %v526_v16 = vand.u32 2147483647, %v524_v10 }
  0x65   : > { %972 = vmatprep.subr.bf16.mxu1 %v662_v57  ;;  %v404_v17 = vsub.f32 1.0, %v402_v8  ;;  %v651_v18 = vand.u32 2147483647, %v649_v11  ;;  %v650_v19 = vsub.f32 %v648_v2, %v1353_v6  ;;  %v527_v23 = vand.u32 2147483647, %v525_v12 }
  0x66   : > { %957 = vmatmul.mubr.msk.bf16.vlgmr.msra.gmra.mrb[0].mxu0 %vm296_vm0, %v1056_v46  ;;  %v279_v20 = vmax.f32 %v277_v13, 0.0  ;;  %v405_v4 = vmax.f32 %v403_v14, 0.0  ;;  %v280_v21 = vmax.f32 %v278_v15, 0.0  ;;  %v528_v22 = vsub.f32 1.0, %v526_v16 }
  0x67   : > { %963 = vmatmul.mubr.msk.bf16.vlgmr.msra.gmra.mrb[0].mxu1 %vm296_vm0, %v1057_v48  ;;  %967 = vmatpush3.bf16.msra.mxu0 %v537_v53  ;;  %v406_v25 = vmax.f32 %v404_v17, 0.0  ;;  %v653_v26 = vsub.f32 1.0, %v651_v18  ;;  %v652_v27 = vand.u32 2147483647, %v650_v19  ;;  %v529_v38 = vsub.f32 1.0, %v527_v23 }
  0x68   : > { %968 = vmatprep.mubr.msk.bf16.mxu0 %vm296_vm0, %v1058_v52  ;;  %974 = vmatprep.mubr.msk.bf16.mxu1 %vm296_vm0, %v1059_v56  ;;  %v530_v37 = vmax.f32 %v528_v22, 0.0 }
  0x69   : > { %973 = vmatpush3.bf16.msra.mxu1 %v662_v57  ;;  %v655_v42 = vmax.f32 %v653_v26, 0.0  ;;  %v654_v43 = vsub.f32 1.0, %v652_v27 }
  0x6b   : > { %v656_v1 = vmax.f32 %v654_v43, 0.0 }
  0x6e   : > { %969 = vmatmul.mubr.msk.bf16.vlgmr.msra.gmra.mrb[4].mxu0 %vm296_vm0, %v1060_v58 }
  0x6f   : > { %975 = vmatmul.mubr.msk.bf16.vlgmr.msra.gmra.mrb[4].mxu1 %vm296_vm0, %v1061_v59  ;;  %v531_v59 = vmax.f32 %v529_v38, 0.0 }
 0x139   : > { %v958_v24 = vpop.f32.mrb[0].mxu0 }
 0x13a   : > { %v354_v5 = vmul.f32 %v958_v24, %v279_v20  ;;  %v964_v28 = vpop.f32.mrb[0].mxu1  ;;  %v337_v29 = vpop.f32.mrb[1].mxu0 }
 0x13b   : > { %v480_v30 = vmul.f32 %v964_v28, %v405_v4  ;;  %v352_v31 = vmul.f32 %v337_v29, %v279_v20  ;;  %v463_v32 = vpop.f32.mrb[1].mxu1  ;;  %v959_v33 = vpop.f32.mrb[2].mxu0 }
 0x13c   : > { %v478_v34 = vmul.f32 %v463_v32, %v405_v4  ;;  %v355_v35 = vmul.f32 %v959_v33, %v280_v21  ;;  %v965_v36 = vpop.f32.mrb[2].mxu1  ;;  %v340_v6 = vpop.f32.mrb[3].mxu0  ;;  %v365_v44 = vsel %vm296_vm0, %v354_v5, 0.0 }
 0x13d   : > { %v481_v39 = vmul.f32 %v965_v36, %v406_v25  ;;  %v353_v40 = vmul.f32 %v340_v6, %v280_v21  ;;  %v466_v41 = vpop.f32.mrb[3].mxu1  ;;  %v491_v45 = vsel %vm296_vm0, %v480_v30, 0.0  ;;  %v356_v48 = vsel %vm296_vm0, %v352_v31, 0.0 }
 0x13e   : > { %v366_v46 = vsel %vm296_vm0, %v355_v35, 0.0  ;;  %v479_v47 = vmul.f32 %v466_v41, %v406_v25  ;;  %v482_v52 = vsel %vm296_vm0, %v478_v34, 0.0 }
 0x13f   : > { %v367_v49 = vadd.f32 %v366_v46, %v365_v44  ;;  %v492_v50 = vsel %vm296_vm0, %v481_v39, 0.0  ;;  %v357_v51 = vsel %vm296_vm0, %v353_v40, 0.0 }
 0x140   : > { %v493_v53 = vadd.f32 %v492_v50, %v491_v45  ;;  %v358_v54 = vadd.f32 %v357_v51, %v356_v48  ;;  %v483_v55 = vsel %vm296_vm0, %v479_v47, 0.0 }
 0x141   : > { %v368_v56 = vrot.slane %v367_v49, 4  ;;  %v484_v57 = vadd.f32 %v483_v55, %v482_v52  ;;  %v970_v58 = vpop.f32.mrb[4].mxu0 }
 0x142   : > { %v494_v60 = vrot.slane %v493_v53, 4  ;;  %v359_v61 = vrot.slane %v358_v54, 4  ;;  %v605_v62 = vmul.f32 %v970_v58, %v530_v37  ;;  %v976_v63 = vpop.f32.mrb[4].mxu1  ;;  %v588_v0 = vpop.f32.mrb[5].mxu0 }
 0x143   : > { %v369_v2 = vadd.f32 %v368_v56, %v367_v49  ;;  %v485_v3 = vrot.slane %v484_v57, 4  ;;  %v730_v7 = vmul.f32 %v976_v63, %v655_v42  ;;  %v603_v9 = vmul.f32 %v588_v0, %v530_v37  ;;  %v713_v10 = vpop.f32.mrb[5].mxu1  ;;  %v971_v8 = vpop.f32.mrb[6].mxu0 }
 0x144   : > { %v495_v11 = vadd.f32 %v494_v60, %v493_v53  ;;  %v360_v13 = vadd.f32 %v359_v61, %v358_v54  ;;  %v616_v14 = vsel %vm296_vm0, %v605_v62, 0.0  ;;  %v728_v15 = vmul.f32 %v713_v10, %v655_v42  ;;  %v977_v16 = vpop.f32.mrb[6].mxu1  ;;  %v591_v12 = vpop.f32.mrb[7].mxu0 }
 0x145   : > { %v370_v17 = vrot.slane %v369_v2, 2  ;;  %v486_v18 = vadd.f32 %v485_v3, %v484_v57  ;;  %v741_v19 = vsel %vm296_vm0, %v730_v7, 0.0  ;;  %v607_v20 = vsel %vm296_vm0, %v603_v9, 0.0  ;;  %v716_v4 = vpop.f32.mrb[7].mxu1 }
 0x146   : > { %v496_v21 = vrot.slane %v495_v11, 2  ;;  %v361_v22 = vrot.slane %v360_v13, 2  ;;  %v732_v23 = vsel %vm296_vm0, %v728_v15, 0.0  ;;  %v606_v24 = vmul.f32 %v971_v8, %v531_v59 }
 0x147   : > { %v371_v25 = vadd.f32 %v370_v17, %v369_v2  ;;  %v487_v26 = vrot.slane %v486_v18, 2  ;;  %v731_v27 = vmul.f32 %v977_v16, %v656_v1  ;;  %v604_v5 = vmul.f32 %v591_v12, %v531_v59 }
 0x148   : > { %v497_v28 = vadd.f32 %v496_v21, %v495_v11  ;;  %v362_v29 = vadd.f32 %v361_v22, %v360_v13  ;;  %v617_v30 = vsel %vm296_vm0, %v606_v24, 0.0  ;;  %v729_v31 = vmul.f32 %v716_v4, %v656_v1 }
 0x149   : > { %v372_v32 = vrot.slane %v371_v25, 1  ;;  %v488_v33 = vadd.f32 %v487_v26, %v486_v18  ;;  %v618_v34 = vadd.f32 %v617_v30, %v616_v14  ;;  %v742_v35 = vsel %vm296_vm0, %v731_v27, 0.0 }
 0x14a   : > { %v498_v36 = vrot.slane %v497_v28, 1  ;;  %v363_v6 = vrot.slane %v362_v29, 1  ;;  %v743_v37 = vadd.f32 %v742_v35, %v741_v19  ;;  %v608_v38 = vsel %vm296_vm0, %v604_v5, 0.0 }
 0x14b   : > { %v373_v39 = vadd.f32 %v372_v32, %v371_v25  ;;  %v489_v40 = vrot.slane %v488_v33, 1  ;;  %v619_v41 = vrot.slane %v618_v34, 4  ;;  %v609_v42 = vadd.f32 %v608_v38, %v607_v20 }
 0x14c   : > { %v499_v43 = vadd.f32 %v498_v36, %v497_v28  ;;  %v364_v44 = vadd.f32 %v363_v6, %v362_v29  ;;  %v744_v45 = vrot.slane %v743_v37, 4  ;;  %v733_v46 = vsel %vm296_vm0, %v729_v31, 0.0 }
 0x14d   : > { %v490_v47 = vadd.f32 %v489_v40, %v488_v33  ;;  %v620_v48 = vadd.f32 %v619_v41, %v618_v34  ;;  %v610_v49 = vrot.slane %v609_v42, 4  ;;  %v734_v50 = vadd.f32 %v733_v46, %v732_v23 }
 0x14e   : > { %v377_v51 = vsel %vm376_vm1, %v373_v39, %v364_v44  ;;  %v745_v52 = vadd.f32 %v744_v45, %v743_v37 }
 0x14f   : > { %380 = vst.msk [vmem:[%s246_s21] sm:$0x3] %vm379_vm2, %v377_v51  ;;  %v502_v53 = vsel %vm376_vm1, %v499_v43, %v490_v47  ;;  %v621_v54 = vrot.slane %v620_v48, 2  ;;  %v611_v55 = vadd.f32 %v610_v49, %v609_v42  ;;  %v735_v56 = vrot.slane %v734_v50, 4 }
 0x150   : > { %912 = vst.msk [vmem:[%s246_s21 + $0x2] sm:$0x3] %vm379_vm2, %v502_v53  ;;  %v746_v57 = vrot.slane %v745_v52, 2 }
 0x151   : > { %v622_v58 = vadd.f32 %v621_v54, %v620_v48  ;;  %v612_v59 = vrot.slane %v611_v55, 2  ;;  %v736_v60 = vadd.f32 %v735_v56, %v734_v50 }
 0x152   : > { %v747_v61 = vadd.f32 %v746_v57, %v745_v52 }
 0x153   : > { %v623_v62 = vrot.slane %v622_v58, 1  ;;  %v613_v63 = vadd.f32 %v612_v59, %v611_v55  ;;  %v737_v0 = vrot.slane %v736_v60, 2 }
 0x154   : > { %v748_v1 = vrot.slane %v747_v61, 1 }
 0x155   : > { %v624_v2 = vadd.f32 %v623_v62, %v622_v58  ;;  %v614_v3 = vrot.slane %v613_v63, 1  ;;  %v738_v7 = vadd.f32 %v737_v0, %v736_v60 }
 0x156   : > { %v749_v9 = vadd.f32 %v748_v1, %v747_v61 }
 0x157   : > { %v615_v10 = vadd.f32 %v614_v3, %v613_v63  ;;  %v739_v8 = vrot.slane %v738_v7, 1 }
 0x159   : > { %v627_v11 = vsel %vm376_vm1, %v624_v2, %v615_v10  ;;  %v740_v13 = vadd.f32 %v739_v8, %v738_v7 }
 0x15a   : > { %922 = vst.msk [vmem:[%s246_s21 + $0x4] sm:$0x3] %vm379_vm2, %v627_v11 }
 0x15b   : > { %v752_v14 = vsel %vm376_vm1, %v749_v9, %v740_v13 }
 0x15c   : > { %932 = vst.msk [vmem:[%s246_s21 + $0x6] sm:$0x3] %vm379_vm2, %v752_v14 }
 0x15d   : > { %1103 = shalt.err (!%p1100_p13)
}
 0x15e   : > { %s1104_s6 = scalar_lea.hbm %s1426_s28, 128  ;;  %s1108_s20 = scalar_lea.hbm %s1482_s2, 256 }
 0x15f   : > { %p1105_p0 = scmp.ne.s32.totalorder %s1426_s28, %s1104_s6  ;;  %p1109_p1 = scmp.lt.u32.totalorder %s1426_s28, %s1482_s2 }
 0x160   : > { %p1110_p5 = scmp.lt.u32.totalorder %s1108_s20, %s1104_s6  ;;  %p1112_p4 = scmp.lt.u32.totalorder %s1104_s6, %s1426_s28 }
 0x161   : > { %p1106_p2 = pnand %p1105_p0, %p1489_p8 }
 0x162   : > { %p1111_p6 = por %p1110_p5, %p1109_p1 }
 0x163   : > { %p1107_p3 = pneg %p1106_p2 }
 0x164   : > { %p1113_p9 = por %p1112_p4, %p1111_p6 }
 0x166   : > { %p1114_p11 = pnand %p1113_p9, %p1107_p3 }
 0x168   : > { %1117 = shalt.err (!%p1114_p11)
}
 0x169   : > { %s1188_s8 = smov 32   ;;  %s1189_s21 = smov 2  }
 0x16a   : > { %989 = dma.vmem_to_hbm [thread:$0]  (%p1489_p8), %s1428_s30, 128, %s1426_s28, %s757_s12, %s1188_s8, %s1188_s8, %s1189_s21  }
 0x16b PF: > { %s787_s15 = sand.u32 1, %s1156_s9   ;;  %p1490_p12 = scmp.ne.s32.totalorder %s1488_s24, 0 }
 0x16c   : > { %p1491_p7 = scmp.ge.s32.totalorder %s1176_s14, 2  ;;  %s788_s26 = scalar_lea.sflag [#allocation4], %s787_s15 }
 0x16e   : > { %p992_p10 = pnand %p1491_p7, %p1490_p12 }
 0x170   : > { %1151 = dma.done.wait (!%p992_p10), %s788_s26, 128  }
 0x171   : > { %1153 = vsyncadd (!%p992_p10), %s788_s26, 4294967168  ;;  %s21_s14 = sadd.s32 1, %s1176_s14   ;;  %s1492_s9 = smov %s1160_s10 }
 0x172   : > { %p18_p13 = scmp.ge.s32.totalorder %s21_s14, 4   ;;  %s1493_s10 = smov %s1164_s11 }
 0x173   : > { %s1494_s11 = smov %s1261_s23  ;;  %s1495_s12 = smov %s1172_s13 }
 0x174   : > { %s1496_s13 = smov %s1498_s17  ;;  %20 = sbr.rel (!%p18_p13) target bundleno = 8 (0x8), region = 100 }
 0x17b   :  { %793 = vsyncpa [#allocation3], 1 }
 0x17c   :  { %795 = vsyncpa [#allocation3 + $0x1], 1 }
 0x17d   :  { %796 = vsyncpa [#allocation6], 1 }
 0x17e   :  { %798 = vsyncpa [#allocation6 + $0x1], 1 }
 0x17f   :  { %799 = vsyncpa [#allocation4], 1 }
 0x180   :  { %801 = vsyncpa [#allocation4 + $0x1], 1 }

</bundles_post_ra>
